<compile_context>
chip_gen: v6e
topology: v6e:2x2x1
jax: 0.10.0
libtpu: 0.0.40
codegen_flags: <defaults>
</compile_context>

<pallas_src>
import functools

import jax
import jax.numpy as jnp
import numpy as np
from jax.experimental import pallas as pl
from jax.experimental.pallas import tpu as pltpu

_NEG = -1e30  # large-negative pad (not -inf: 0 * -inf = NaN in the one-hot matmul)


def _round_up(x, m):
    return (x + m - 1) // m * m


def _bigram_loss_kernel(idx_ref, tgt_ref, w_ref, logits_ref, loss_ref, *, n_valid):
    """One grid step == one block of TB tokens.

    idx_ref    : (TB, 1)  int32  token ids
    tgt_ref    : (TB, 1)  int32  target ids
    w_ref      : (Vp, Vp) f32    whole padded embedding table (VMEM-resident)
    logits_ref : (TB, Vp) f32    logits for this block
    loss_ref   : (TB, 1)  f32    per-token cross-entropy (0 for padding tokens)
    """
    tb, vp = logits_ref.shape
    lane = jax.lax.broadcasted_iota(jnp.int32, (tb, vp), 1)

    # Embedding lookup as a one-hot matmul on the MXU (exact: one-hot is 0/1).
    one_hot = (lane == idx_ref[...]).astype(jnp.float32)                  # (TB, Vp)
    logits = jnp.dot(one_hot, w_ref[...],
                     preferred_element_type=jnp.float32,
                     precision=jax.lax.Precision.HIGHEST)                 # (TB, Vp)
    logits_ref[...] = logits

    # Block-wide cross-entropy: logsumexp(row) - row[target].
    m = jnp.max(logits, axis=-1, keepdims=True)                           # (TB, 1)
    lse = jnp.log(jnp.sum(jnp.exp(logits - m), axis=-1, keepdims=True)) + m
    tgt_logit = jnp.sum(jnp.where(lane == tgt_ref[...], logits, 0.0),
                        axis=-1, keepdims=True)                           # (TB, 1)

    # Valid-token mask computed in-kernel (no extra input stream).
    row = jax.lax.broadcasted_iota(jnp.int32, (tb, 1), 0)
    gidx = pl.program_id(0) * tb + row
    loss_ref[...] = jnp.where(gidx < n_valid, lse - tgt_logit, 0.0)


def _bigram_logits_kernel(idx_ref, w_ref, logits_ref):
    """Inference-path variant: logits only, no loss math."""
    tb, vp = logits_ref.shape
    lane = jax.lax.broadcasted_iota(jnp.int32, (tb, vp), 1)
    one_hot = (lane == idx_ref[...]).astype(jnp.float32)
    logits_ref[...] = jnp.dot(one_hot, w_ref[...],
                              preferred_element_type=jnp.float32,
                              precision=jax.lax.Precision.HIGHEST)


def bigram_forward(w, idx, targets=None):
    """Matches BigramLanguageModel.forward:
       targets=None -> (logits (B, T, V), None)
       else         -> (logits (B*T, V), scalar mean cross-entropy loss)
    """
    B, T = idx.shape
    V = w.shape[0]
    N = B * T

    Vp = _round_up(V, 128)                        # lane-dense vocab dimension
    TB = _round_up(N, 8) if N <= 512 else 512     # token block (sublane-aligned)
    Np = _round_up(N, TB)
    G = Np // TB

    w_pad = jnp.pad(w.astype(jnp.float32), ((0, Vp - V), (0, Vp - V)),
                    constant_values=_NEG)

    idx_flat = idx.reshape(N).astype(jnp.int32)
    idx_pad = jnp.pad(idx_flat, (0, Np - N)).reshape(Np, 1)

    w_spec = pl.BlockSpec((Vp, Vp), lambda i: (0, 0))        # resident across grid
    col_spec = pl.BlockSpec((TB, 1), lambda i: (i, 0))
    logits_spec = pl.BlockSpec((TB, Vp), lambda i: (i, 0))

    cparams = pltpu.CompilerParams(dimension_semantics=("parallel",))

    if targets is None:
        logits_pad = pl.pallas_call(
            _bigram_logits_kernel,
            grid=(G,),
            in_specs=[col_spec, w_spec],
            out_specs=logits_spec,
            out_shape=jax.ShapeDtypeStruct((Np, Vp), jnp.float32),
            compiler_params=cparams,
        )(idx_pad, w_pad)
        return logits_pad[:N, :V].reshape(B, T, V), None

    tgt_flat = targets.reshape(N).astype(jnp.int32)
    tgt_pad = jnp.pad(tgt_flat, (0, Np - N)).reshape(Np, 1)

    logits_pad, per_token_loss = pl.pallas_call(
        functools.partial(_bigram_loss_kernel, n_valid=N),
        grid=(G,),
        in_specs=[col_spec, col_spec, w_spec],
        out_specs=(logits_spec, col_spec),
        out_shape=(jax.ShapeDtypeStruct((Np, Vp), jnp.float32),
                   jax.ShapeDtypeStruct((Np, 1), jnp.float32)),
        compiler_params=cparams,
    )(idx_pad, tgt_pad, w_pad)

    logits = logits_pad[:N, :V]
    loss = jnp.sum(per_token_loss) / N            # F.cross_entropy mean reduction
    return logits, loss


def ref_forward(w, idx, targets):
    """Pure-JAX reference (mirrors the PyTorch module)."""
    logits = w[idx]                                # (B, T, V)
    B, T, V = logits.shape
    lf = logits.reshape(B * T, V)
    tf = targets.reshape(B * T)
    logp = jax.nn.log_softmax(lf, axis=-1)
    loss = -jnp.mean(logp[jnp.arange(B * T), tf])
    return lf, loss


# TODO(synk): generate() (autoregressive sampling with torch.multinomial) is a
# host-side loop around forward(); it is not part of the forward pass ported here.

if __name__ == "__main__":
    vocab_size = 65          # e.g. tiny-shakespeare char vocab
    B, T = 2, 8

    key = jax.random.PRNGKey(0)
    k_w, k_idx, k_tgt = jax.random.split(key, 3)

    # nn.Embedding(vocab_size, vocab_size) default init: N(0, 1)
    w = jax.random.normal(k_w, (vocab_size, vocab_size), dtype=jnp.float32)
    idx = jax.random.randint(k_idx, (B, T), 0, vocab_size, dtype=jnp.int32)
    targets = jax.random.randint(k_tgt, (B, T), 0, vocab_size, dtype=jnp.int32)

    # training path: (B*T, V) logits + scalar mean loss
    logits, loss = bigram_forward(w, idx, targets)
    jax.block_until_ready((logits, loss))

    # inference path: (B, T, V) logits, loss is None
    logits_nt, loss_nt = bigram_forward(w, idx, None)
    jax.block_until_ready(logits_nt)
    assert loss_nt is None
    assert logits_nt.shape == (B, T, vocab_size)

    # correctness vs pure-JAX reference
    ref_logits, ref_loss = ref_forward(w, idx, targets)
    np.testing.assert_allclose(np.asarray(logits), np.asarray(ref_logits),
                               rtol=1e-5, atol=1e-5)
    np.testing.assert_allclose(float(loss), float(ref_loss), rtol=1e-5, atol=1e-5)
    np.testing.assert_allclose(np.asarray(logits_nt.reshape(B * T, vocab_size)),
                               np.asarray(ref_logits), rtol=1e-5, atol=1e-5)

    # multi-block path with token padding (exercises TB=512 blocks + in-kernel mask)
    B2, T2 = 5, 300   # N = 1500 -> 3 blocks of 512, 36 padding tokens
    k_i2, k_t2 = jax.random.split(k_tgt)
    idx2 = jax.random.randint(k_i2, (B2, T2), 0, vocab_size, dtype=jnp.int32)
    tgt2 = jax.random.randint(k_t2, (B2, T2), 0, vocab_size, dtype=jnp.int32)
    logits2, loss2 = bigram_forward(w, idx2, tgt2)
    jax.block_until_ready((logits2, loss2))
    ref_logits2, ref_loss2 = ref_forward(w, idx2, tgt2)
    np.testing.assert_allclose(np.asarray(logits2), np.asarray(ref_logits2),
                               rtol=1e-5, atol=1e-5)
    np.testing.assert_allclose(float(loss2), float(ref_loss2), rtol=1e-5, atol=1e-5)

    print("KERNEL_OK")
</pallas_src>

<mosaic_0001>
module attributes {stable_mosaic.version = 11 : i64} {
  func.func @_bigram_loss_kernel(%arg0: i32, %arg1: memref<16x1xi32, #tpu.memory_space<vmem>>, %arg2: memref<16x1xi32, #tpu.memory_space<vmem>>, %arg3: memref<128x128xf32, #tpu.memory_space<vmem>>, %arg4: memref<16x128xf32, #tpu.memory_space<vmem>>, %arg5: memref<16x1xf32, #tpu.memory_space<vmem>>) attributes {dimension_semantics = [#tpu.dimension_semantics<parallel>], iteration_bounds = array<i64: 1>, scalar_prefetch = 0 : i64, scratch_operands = 0 : i64, tpu.core_type = #tpu.core_type<tc>, window_params = [{transform_indices = @transform_0, window_bounds = array<i64: 16, 1>}, {transform_indices = @transform_1, window_bounds = array<i64: 16, 1>}, {pipeline_mode = #tpu.pipeline_mode<synchronous>, transform_indices = @transform_2, window_bounds = array<i64: 128, 128>}, {transform_indices = @transform_3, window_bounds = array<i64: 16, 128>}, {transform_indices = @transform_4, window_bounds = array<i64: 16, 1>}]} {
    %0 = tpu.iota {dimensions = array<i32: 1>} : vector<16x128xi32>
    %c0 = arith.constant 0 : index
    %c0_0 = arith.constant 0 : index
    %1 = vector.load %arg1[%c0, %c0_0] : memref<16x1xi32, #tpu.memory_space<vmem>>, vector<16x1xi32>
    %2 = vector.broadcast %1 : vector<16x1xi32> to vector<16x128xi32>
    %3 = arith.cmpi eq, %0, %2 : vector<16x128xi32>
    %4 = arith.extui %3 : vector<16x128xi1> to vector<16x128xi32>
    %5 = arith.sitofp %4 : vector<16x128xi32> to vector<16x128xf32>
    %c0_1 = arith.constant 0 : index
    %c0_2 = arith.constant 0 : index
    %6 = vector.load %arg3[%c0_1, %c0_2] : memref<128x128xf32, #tpu.memory_space<vmem>>, vector<128x128xf32>
    %cst = arith.constant dense<0.000000e+00> : vector<16x128xf32>
    %7 = tpu.matmul %5, %6, %cst {dimension_numbers = #tpu.dot_dimension_numbers<[1], [0], [0], [1], [0, 0, 1, 1], [], []>, precision = #tpu.contract_precision<fp32>} : vector<16x128xf32>, vector<128x128xf32>, vector<16x128xf32> -> vector<16x128xf32>
    %c0_3 = arith.constant 0 : index
    %c0_4 = arith.constant 0 : index
    %8 = vector.load %arg4[%c0_3, %c0_4] : memref<16x128xf32, #tpu.memory_space<vmem>>, vector<16x128xf32>
    tpu.vector_store %arg4[%c0_3, %c0_4], %7 {strides = array<i32>} : memref<16x128xf32, #tpu.memory_space<vmem>>, vector<16x128xf32>,
    %cst_5 = arith.constant dense<0xFF800000> : vector<16xf32>
    %9 = vector.multi_reduction <maximumf>, %7, %cst_5 [1] : vector<16x128xf32> to vector<16xf32>
    %10 = vector.shape_cast %9 : vector<16xf32> to vector<16x1xf32>
    %11 = vector.broadcast %10 : vector<16x1xf32> to vector<16x128xf32>
    %12 = arith.subf %7, %11 : vector<16x128xf32>
    %13 = math.exp %12 : vector<16x128xf32>
    %cst_6 = arith.constant dense<0.000000e+00> : vector<16xf32>
    %14 = vector.multi_reduction <add>, %13, %cst_6 [1] : vector<16x128xf32> to vector<16xf32>
    %15 = vector.shape_cast %14 : vector<16xf32> to vector<16x1xf32>
    %16 = math.log %15 : vector<16x1xf32>
    %17 = arith.addf %16, %10 : vector<16x1xf32>
    %c0_7 = arith.constant 0 : index
    %c0_8 = arith.constant 0 : index
    %18 = vector.load %arg2[%c0_7, %c0_8] : memref<16x1xi32, #tpu.memory_space<vmem>>, vector<16x1xi32>
    %19 = vector.broadcast %18 : vector<16x1xi32> to vector<16x128xi32>
    %20 = arith.cmpi eq, %0, %19 : vector<16x128xi32>
    %cst_9 = arith.constant 0.000000e+00 : f32
    %21 = vector.broadcast %cst_9 : f32 to vector<16x128xf32>
    %22 = arith.select %20, %7, %21 : vector<16x128xi1>, vector<16x128xf32>
    %cst_10 = arith.constant dense<0.000000e+00> : vector<16xf32>
    %23 = vector.multi_reduction <add>, %22, %cst_10 [1] : vector<16x128xf32> to vector<16xf32>
    %24 = vector.shape_cast %23 : vector<16xf32> to vector<16x1xf32>
    %25 = tpu.iota {dimensions = array<i32: 0>} : vector<16x1xi32>
    %c16_i32 = arith.constant 16 : i32
    %26 = arith.muli %arg0, %c16_i32 : i32
    %27 = vector.broadcast %26 : i32 to vector<16x1xi32>
    %28 = arith.addi %27, %25 : vector<16x1xi32>
    %c16_i32_11 = arith.constant 16 : i32
    %29 = vector.broadcast %c16_i32_11 : i32 to vector<16x1xi32>
    %30 = arith.cmpi slt, %28, %29 : vector<16x1xi32>
    %31 = arith.subf %17, %24 : vector<16x1xf32>
    %cst_12 = arith.constant 0.000000e+00 : f32
    %32 = vector.broadcast %cst_12 : f32 to vector<16x1xf32>
    %33 = arith.select %30, %31, %32 : vector<16x1xi1>, vector<16x1xf32>
    %c0_13 = arith.constant 0 : index
    %c0_14 = arith.constant 0 : index
    %34 = vector.load %arg5[%c0_13, %c0_14] : memref<16x1xf32, #tpu.memory_space<vmem>>, vector<16x1xf32>
    tpu.vector_store %arg5[%c0_13, %c0_14], %33 {strides = array<i32>} : memref<16x1xf32, #tpu.memory_space<vmem>>, vector<16x1xf32>,
    return
  }
  func.func @transform_0(%arg0: i32) -> (i32, i32) {
    %c0_i32 = arith.constant 0 : i32
    %c0_i32_0 = arith.constant 0 : i32
    return %arg0, %c0_i32 : i32, i32
  }
  func.func @transform_1(%arg0: i32) -> (i32, i32) {
    %c0_i32 = arith.constant 0 : i32
    %c0_i32_0 = arith.constant 0 : i32
    return %arg0, %c0_i32 : i32, i32
  }
  func.func @transform_2(%arg0: i32) -> (i32, i32) {
    %c0_i32 = arith.constant 0 : i32
    %c0_i32_0 = arith.constant 0 : i32
    %c0_i32_1 = arith.constant 0 : i32
    return %c0_i32, %c0_i32_0 : i32, i32
  }
  func.func @transform_3(%arg0: i32) -> (i32, i32) {
    %c0_i32 = arith.constant 0 : i32
    %c0_i32_0 = arith.constant 0 : i32
    return %arg0, %c0_i32 : i32, i32
  }
  func.func @transform_4(%arg0: i32) -> (i32, i32) {
    %c0_i32 = arith.constant 0 : i32
    %c0_i32_0 = arith.constant 0 : i32
    return %arg0, %c0_i32 : i32, i32
  }
}

</mosaic_0001>

<bundles_post_ra>
// kernel: tpu_custom_call.1
= control target key start
LH: loop header
LB: loop body
LE: loop exit
PB: predicated region body
PF: predicated region fallthrough
CT: control target
= control target key end

     0   :  { %10 = vsyncpa [#allocation3], 0  ;;  %s1638_s0 = inlined_call_operand.vmem [shape: s32[16,1], index: 0, kind: input, shape index: {}]   ;;  %s1639_s1 = inlined_call_operand.vmem [shape: s32[16,1], index: 1, kind: input, shape index: {}]   ;;  %s1640_s2 = inlined_call_operand.hbm [shape: f32[128,128], index: 2, kind: input, shape index: {}]   ;;  %s1641_s3 = inlined_call_operand.hbm [shape: f32[16,128], index: 3, kind: output, shape index: {0}]   ;;  %s1642_s4 = inlined_call_operand.vmem [shape: f32[16,1], index: 4, kind: output, shape index: {1}]  }
   0x1   :  { %11 = vsyncpa [#allocation4], 0  ;;  %s1209_s15 = smov [#allocation2]  }
   0x2   :  { %s21_s16 = sshll.u32 %s1209_s15, 4  ;;  %s22_s16 = int_to_ptr.vmem [resolvable:$true] %s21_s16 }
   0x3   :  { %s1173_s17 = scalar_lea.vmem %s22_s16, 2048  ;;  %p1178_p1 = scmp.lt.s32.totalorder %s22_s16, %s22_s16 }
   0x4   :  { %p1174_p0 = scmp.ne.s32.totalorder %s22_s16, %s1173_s17  ;;  %p1179_p2 = scmp.lt.s32.totalorder %s1173_s17, %s1173_s17 }
   0x6   :  { %p1180_p3 = por %p1179_p2, %p1178_p1 }
   0x8   :  { %p1181_p4 = pnand %p1180_p3, %p1174_p0 }
   0xa   :  { %1184 = shalt.err (!%p1181_p4)
}
   0xb   :  { %s1210_s18 = smov 128   ;;  %s1211_s19 = smov 8  }
   0xc   :  { %27 = dma.hbm_to_vmem [thread:$0]  %s1640_s2, 2048, %s22_s16, [#allocation3], %s1210_s18, %s1210_s18, %s1211_s19  }
   0xd   :  { %1205 = dma.done.wait [#allocation3], 2048  }
   0xe   :  { %1206 = vsyncadd [#allocation3], 4294965248  ;;  %v1212_v0 = vmov 0   ;;  %v33_v1 = vld [vmem:[%s1638_s0] sm:$0xff]  ;;  %v34_v2 = vld [vmem:[%s1638_s0 + $0x8] sm:$0xff] }
   0xf   :  { %1155 = vset.pattern.permute.xlu0 %v1212_v0  ;;  %1156 = vset.pattern.permute.xlu1 %v1212_v0  ;;  %v62_v3 = vld [vmem:[#allocation2 + $0x78] sm:$0xff]  ;;  %v61_v4 = vld [vmem:[#allocation2 + $0x70] sm:$0xff]  ;;  %v60_v5 = vld [vmem:[#allocation2 + $0x68] sm:$0xff] }
  0x10   :  { %36 = vperm.xlu0 %1155, %v33_v1   ;;  %v1253_v6 = vand.u32 4294901760, %v62_v3  ;;  %v1255_v7 = vand.u32 4294901760, %v61_v4  ;;  %v1257_v8 = vand.u32 4294901760, %v60_v5  ;;  %v59_v9 = vld [vmem:[#allocation2 + $0x60] sm:$0xff]  ;;  %v58_v10 = vld [vmem:[#allocation2 + $0x58] sm:$0xff]  ;;  %v57_v11 = vld [vmem:[#allocation2 + $0x50] sm:$0xff] }
  0x11   :  { %v1259_v12 = vand.u32 4294901760, %v59_v9  ;;  %v1261_v13 = vand.u32 4294901760, %v58_v10  ;;  %v1263_v14 = vand.u32 4294901760, %v57_v11  ;;  %v56_v15 = vld [vmem:[#allocation2 + $0x48] sm:$0xff]  ;;  %v55_v16 = vld [vmem:[#allocation2 + $0x40] sm:$0xff]  ;;  %v54_v37 = vld [vmem:[#allocation2 + $0x38] sm:$0xff] }
  0x12   :  { %v1266_v17 = vsub.f32 %v62_v3, %v1253_v6  ;;  %v1269_v18 = vsub.f32 %v61_v4, %v1255_v7  ;;  %v1272_v19 = vsub.f32 %v60_v5, %v1257_v8  ;;  %938 = vmatprep.subr.mxu0 %v1253_v6  ;;  %v1275_v20 = vand.u32 4294901760, %v56_v15  ;;  %v769_v25 = vld [vmem:[%s1639_s1] sm:$0xff]  ;;  %v53_v38 = vld [vmem:[#allocation2 + $0x30] sm:$0xff]  ;;  %v52_v39 = vld [vmem:[#allocation2 + $0x28] sm:$0xff] }
  0x13   :  { %v1278_v21 = vsub.f32 %v59_v9, %v1259_v12  ;;  %v1281_v22 = vsub.f32 %v58_v10, %v1261_v13  ;;  %939 = vmatpush3.msra.mxu0 %v1253_v6  ;;  %v1285_v23 = vsub.f32 %v57_v11, %v1263_v14  ;;  %v1287_v24 = vand.u32 4294901760, %v55_v16  ;;  %v51_v45 = vld [vmem:[#allocation2 + $0x20] sm:$0xff]  ;;  %v50_v52 = vld [vmem:[#allocation2 + $0x18] sm:$0xff]  ;;  %v49_v58 = vld [vmem:[#allocation2 + $0x10] sm:$0xff] }
  0x14   :  { %39 = vperm.xlu0 %1155, %v34_v2   ;;  %v1293_v26 = vand.u32 4294901760, %v1266_v17  ;;  %v1296_v27 = vand.u32 4294901760, %v1269_v18  ;;  %v1299_v28 = vand.u32 4294901760, %v1272_v19  ;;  %940 = vmatprep.subr.mxu0 %v1255_v7  ;;  %v1310_v31 = vsub.f32 %v56_v15, %v1275_v20  ;;  %v48_v0 = vld [vmem:[#allocation2 + $0x8] sm:$0xff]  ;;  %v47_v9 = vld [vmem:[#allocation2] sm:$0xff] }
  0x15   :  { %v1303_v29 = vand.u32 4294901760, %v1278_v21  ;;  %v1306_v30 = vand.u32 4294901760, %v1281_v22  ;;  %941 = vmatpush3.msra.mxu0 %v1255_v7  ;;  %v1320_v35 = vand.u32 4294901760, %v1285_v23  ;;  %v1324_v36 = vsub.f32 %v55_v16, %v1287_v24 }
  0x16   :  { %v168_v32 = vsub.f32 %v1266_v17, %v1293_v26  ;;  %v175_v33 = vsub.f32 %v1269_v18, %v1296_v27  ;;  %v182_v34 = vsub.f32 %v1272_v19, %v1299_v28  ;;  %942 = vmatprep.subr.mxu0 %v1257_v8  ;;  %v1332_v44 = vand.u32 4294901760, %v1310_v31 }
  0x17   :  { %943 = vmatpush3.msra.mxu0 %v1257_v8  ;;  %v189_v42 = vsub.f32 %v1278_v21, %v1303_v29  ;;  %v196_v43 = vsub.f32 %v1281_v22, %v1306_v30  ;;  %v1335_v47 = vand.u32 4294901760, %v54_v37  ;;  %v1338_v48 = vand.u32 4294901760, %v53_v38 }
  0x18   :  { %772 = vperm.xlu0 %1155, %v769_v25   ;;  %v169_v40 = vand.u32 4294901760, %v168_v32  ;;  %v176_v41 = vand.u32 4294901760, %v175_v33  ;;  %944 = vmatprep.subr.mxu0 %v1259_v12  ;;  %v183_v46 = vand.u32 4294901760, %v182_v34  ;;  %v1340_v49 = vand.u32 4294901760, %v52_v39 }
  0x19   :  { %945 = vmatpush3.msra.mxu0 %v1259_v12  ;;  %v203_v50 = vsub.f32 %v1285_v23, %v1320_v35  ;;  %v1345_v51 = vand.u32 4294901760, %v1324_v36  ;;  %v190_v53 = vand.u32 4294901760, %v189_v42  ;;  %v1349_v54 = vsub.f32 %v54_v37, %v1335_v47 }
  0x1a   :  { %973 = vmatprep.subr.mxu1 %v169_v40  ;;  %946 = vmatprep.subr.mxu0 %v1261_v13  ;;  %v1352_v55 = vsub.f32 %v53_v38, %v1338_v48  ;;  %v1355_v56 = vand.u32 4294901760, %v51_v45  ;;  %v210_v57 = vsub.f32 %v1310_v31, %v1332_v44  ;;  %v197_v59 = vand.u32 4294901760, %v196_v43 }
  0x1b   :  { %974 = vmatpush3.msra.mxu1 %v169_v40  ;;  %947 = vmatpush3.msra.mxu0 %v1261_v13  ;;  %v1361_v60 = vand.u32 4294901760, %v1349_v54  ;;  %v1364_v61 = vsub.f32 %v52_v39, %v1340_v49  ;;  %v1367_v62 = vand.u32 4294901760, %v50_v52  ;;  %v217_v63 = vsub.f32 %v1324_v36, %v1345_v51 }
  0x1c   :  { %975 = vmatprep.subr.mxu1 %v176_v41  ;;  %948 = vmatprep.subr.mxu0 %v1263_v14  ;;  %v204_v1 = vand.u32 4294901760, %v203_v50  ;;  %v1373_v2 = vand.u32 4294901760, %v1352_v55  ;;  %v1376_v3 = vsub.f32 %v51_v45, %v1355_v56  ;;  %v1379_v4 = vand.u32 4294901760, %v49_v58 }
  0x1d   :  { %976 = vmatpush3.msra.mxu1 %v176_v41  ;;  %949 = vmatpush3.msra.mxu0 %v1263_v14  ;;  %v211_v5 = vand.u32 4294901760, %v210_v57  ;;  %v224_v10 = vsub.f32 %v1349_v54, %v1361_v60  ;;  %v1385_v11 = vand.u32 4294901760, %v1364_v61  ;;  %v1388_v15 = vsub.f32 %v50_v52, %v1367_v62 }
  0x1e   :  { %977 = vmatprep.subr.mxu1 %v183_v46  ;;  %950 = vmatprep.subr.mxu0 %v1275_v20  ;;  %v1391_v16 = vand.u32 4294901760, %v48_v0  ;;  %v218_v25 = vand.u32 4294901760, %v217_v63  ;;  %v231_v32 = vsub.f32 %v1352_v55, %v1373_v2  ;;  %v1397_v33 = vand.u32 4294901760, %v1376_v3 }
  0x1f   :  { %978 = vmatpush3.msra.mxu1 %v183_v46  ;;  %951 = vmatpush3.msra.mxu0 %v1275_v20  ;;  %v1400_v34 = vsub.f32 %v49_v58, %v1379_v4  ;;  %v1403_v37 = vand.u32 4294901760, %v47_v9  ;;  %v225_v38 = vand.u32 4294901760, %v224_v10  ;;  %v238_v39 = vsub.f32 %v1364_v61, %v1385_v11 }
  0x20   :  { %979 = vmatprep.subr.mxu1 %v190_v53  ;;  %952 = vmatprep.subr.mxu0 %v1287_v24  ;;  %v1409_v40 = vand.u32 4294901760, %v1388_v15  ;;  %v1412_v41 = vsub.f32 %v48_v0, %v1391_v16  ;;  %v232_v42 = vand.u32 4294901760, %v231_v32  ;;  %v245_v43 = vsub.f32 %v1376_v3, %v1397_v33 }
  0x21   :  { %980 = vmatpush3.msra.mxu1 %v190_v53  ;;  %953 = vmatpush3.msra.mxu0 %v1287_v24  ;;  %v1419_v45 = vand.u32 4294901760, %v1400_v34  ;;  %v1422_v46 = vsub.f32 %v47_v9, %v1403_v37  ;;  %v239_v50 = vand.u32 4294901760, %v238_v39  ;;  %v1213_v39 = vmov 0.0  }
  0x22   :  { %981 = vmatprep.subr.mxu1 %v197_v59  ;;  %954 = vmatprep.subr.mxu0 %v1335_v47  ;;  %v252_v52 = vsub.f32 %v1388_v15, %v1409_v40  ;;  %v1429_v53 = vand.u32 4294901760, %v1412_v41  ;;  %v246_v57 = vand.u32 4294901760, %v245_v43  ;;  %v1214_v43 = vmov 1.0  }
  0x23   :  { %982 = vmatpush3.msra.mxu1 %v197_v59  ;;  %955 = vmatpush3.msra.mxu0 %v1335_v47  ;;  %v259_v58 = vsub.f32 %v1400_v34, %v1419_v45  ;;  %v1436_v59 = vand.u32 4294901760, %v1422_v46 }
  0x24   :  { %983 = vmatprep.subr.mxu1 %v204_v1  ;;  %956 = vmatprep.subr.mxu0 %v1338_v48  ;;  %v253_v63 = vand.u32 4294901760, %v252_v52  ;;  %v266_v0 = vsub.f32 %v1412_v41, %v1429_v53 }
  0x25   :  { %984 = vmatpush3.msra.mxu1 %v204_v1  ;;  %957 = vmatpush3.msra.mxu0 %v1338_v48  ;;  %v260_v1 = vand.u32 4294901760, %v259_v58 }
  0x26   :  { %985 = vmatprep.subr.mxu1 %v211_v5  ;;  %958 = vmatprep.subr.mxu0 %v1340_v49  ;;  %v267_v9 = vand.u32 4294901760, %v266_v0 }
  0x27   :  { %986 = vmatpush3.msra.mxu1 %v211_v5  ;;  %959 = vmatpush3.msra.mxu0 %v1340_v49  ;;  %v273_v5 = vsub.f32 %v1422_v46, %v1436_v59 }
  0x28   :  { %987 = vmatprep.subr.mxu1 %v218_v25  ;;  %960 = vmatprep.subr.mxu0 %v1355_v56 }
  0x29   :  { %988 = vmatpush3.msra.mxu1 %v218_v25  ;;  %961 = vmatpush3.msra.mxu0 %v1355_v56  ;;  %v274_v10 = vand.u32 4294901760, %v273_v5  ;;  %v31_v25 = vlaneseq }
  0x2a   :  { %989 = vmatprep.subr.mxu1 %v225_v38  ;;  %962 = vmatprep.subr.mxu0 %v1367_v62 }
  0x2b   :  { %990 = vmatpush3.msra.mxu1 %v225_v38  ;;  %963 = vmatpush3.msra.mxu0 %v1367_v62  ;;  %v1450_v32 = vand.u32 127, %v31_v25 }
  0x2c   :  { %991 = vmatprep.subr.mxu1 %v232_v42  ;;  %964 = vmatprep.subr.mxu0 %v1379_v4 }
  0x2d   :  { %992 = vmatpush3.msra.mxu1 %v232_v42  ;;  %965 = vmatpush3.msra.mxu0 %v1379_v4 }
  0x2e   :  { %993 = vmatprep.subr.mxu1 %v239_v50  ;;  %966 = vmatprep.subr.mxu0 %v1391_v16 }
  0x2f   :  { %994 = vmatpush3.msra.mxu1 %v239_v50  ;;  %967 = vmatpush3.msra.mxu0 %v1391_v16 }
  0x30   :  { %995 = vmatprep.subr.mxu1 %v246_v57  ;;  %968 = vmatprep.subr.mxu0 %v1403_v37 }
  0x31   :  { %996 = vmatpush3.msra.mxu1 %v246_v57  ;;  %969 = vmatpush3.msra.mxu0 %v1403_v37 }
  0x32   :  { %997 = vmatprep.subr.mxu1 %v253_v63  ;;  %1008 = vmatprep.subr.mxu0 %v1266_v17 }
  0x33   :  { %998 = vmatpush3.msra.mxu1 %v253_v63 }
  0x34   :  { %999 = vmatprep.subr.mxu1 %v260_v1 }
  0x35   :  { %1000 = vmatpush3.msra.mxu1 %v260_v1 }
  0x36   :  { %1001 = vmatprep.subr.mxu1 %v267_v9 }
  0x37   :  { %1002 = vmatpush3.msra.mxu1 %v267_v9 }
  0x38   :  { %1003 = vmatprep.subr.mxu1 %v274_v10 }
  0x39   :  { %1004 = vmatpush3.msra.mxu1 %v274_v10 }
  0x3a   :  { %1043 = vmatprep.subr.mxu1 %v1253_v6 }
  0x8b   :  { %v1452_v38 = vpop.permute.xlu0 %36 }
  0x8c   :  { %vm41_vm0 = vcmp.eq.s32.totalorder %v1450_v32, %v1452_v38 }
  0x8d   :  { %v822_v42 = vsel %vm41_vm0, 1.0, %v1213_v39  ;;  %1005 = vmatprep.mubr.msk.f32.mxu1 %vm41_vm0, %v1214_v43 }
  0x8e   :  { %v145_v50 = vsub.f32 %v822_v42, %v822_v42 }
  0x8f   :  { %v1463_v52 = vpop.permute.xlu0 %39 }
  0x90   :  { %vm42_vm1 = vcmp.eq.s32.totalorder %v1450_v32, %v1463_v52  ;;  %v146_v57 = vand.u32 4294901760, %v145_v50 }
  0x91   :  { %v823_v58 = vsel %vm42_vm1, 1.0, %v1213_v39  ;;  %1006 = vmatmul.mubr.msk.f32.vlgmr.msra.gmra.mxu1 %vm42_vm1, %v1214_v43 }
  0x92   :  { %v1474_v63 = vsub.f32 %v823_v58, %v823_v58  ;;  %1044 = vmatpush3.msra.mxu1 %v1253_v6  ;;  %1075 = vmatprep.mubr.f32.mxu1 %v146_v57  ;;  %v147_v0 = vsub.f32 %v145_v50, %v146_v57 }
  0x93   :  { %1045 = vmatprep.subr.mxu1 %v1255_v7 }
  0x94   :  { %1046 = vmatpush3.msra.mxu1 %v1255_v7  ;;  %v148_v1 = vand.u32 4294901760, %v147_v0  ;;  %v156_v5 = vand.u32 4294901760, %v1474_v63 }
  0x95   :  { %1047 = vmatprep.subr.mxu1 %v1257_v8 }
  0x96   :  { %1048 = vmatpush3.msra.mxu1 %v1257_v8  ;;  %970 = vmatprep.mubr.f32.mxu0 %v148_v1  ;;  %v157_v9 = vsub.f32 %v1474_v63, %v156_v5 }
  0x97   :  { %1049 = vmatprep.subr.mxu1 %v1259_v12 }
  0x98   :  { %1050 = vmatpush3.msra.mxu1 %v1259_v12  ;;  %v158_v10 = vand.u32 4294901760, %v157_v9 }
  0x99   :  { %1051 = vmatprep.subr.mxu1 %v1261_v13 }
  0x9a   :  { %1052 = vmatpush3.msra.mxu1 %v1261_v13  ;;  %971 = vmatmul.mubr.f32.vlgmr.msra.gmra.mxu0 %v158_v10 }
  0x9b   :  { %1009 = vmatpush3.msra.mxu0 %v1266_v17  ;;  %1053 = vmatprep.subr.mxu1 %v1263_v14 }
  0x9c   :  { %1010 = vmatprep.subr.mxu0 %v1269_v18  ;;  %1040 = vmatprep.mubr.f32.mxu0 %v145_v50 }
  0x9d   :  { %1054 = vmatpush3.msra.mxu1 %v1263_v14  ;;  %1011 = vmatpush3.msra.mxu0 %v1269_v18 }
  0x9e   :  { %1055 = vmatprep.subr.mxu1 %v1275_v20  ;;  %1012 = vmatprep.subr.mxu0 %v1272_v19 }
  0x9f   :  { %1056 = vmatpush3.msra.mxu1 %v1275_v20  ;;  %1013 = vmatpush3.msra.mxu0 %v1272_v19 }
  0xa0   :  { %1057 = vmatprep.subr.mxu1 %v1287_v24  ;;  %1014 = vmatprep.subr.mxu0 %v1278_v21 }
  0xa1   :  { %1058 = vmatpush3.msra.mxu1 %v1287_v24  ;;  %1015 = vmatpush3.msra.mxu0 %v1278_v21 }
  0xa2   :  { %1059 = vmatprep.subr.mxu1 %v1335_v47  ;;  %1016 = vmatprep.subr.mxu0 %v1281_v22 }
  0xa3   :  { %1060 = vmatpush3.msra.mxu1 %v1335_v47  ;;  %1017 = vmatpush3.msra.mxu0 %v1281_v22 }
  0xa4   :  { %1061 = vmatprep.subr.mxu1 %v1338_v48  ;;  %1018 = vmatprep.subr.mxu0 %v1285_v23 }
  0xa5   :  { %1062 = vmatpush3.msra.mxu1 %v1338_v48  ;;  %1019 = vmatpush3.msra.mxu0 %v1285_v23 }
  0xa6   :  { %1063 = vmatprep.subr.mxu1 %v1340_v49  ;;  %1020 = vmatprep.subr.mxu0 %v1310_v31 }
  0xa7   :  { %1064 = vmatpush3.msra.mxu1 %v1340_v49  ;;  %1021 = vmatpush3.msra.mxu0 %v1310_v31 }
  0xa8   :  { %1065 = vmatprep.subr.mxu1 %v1355_v56  ;;  %1022 = vmatprep.subr.mxu0 %v1324_v36 }
  0xa9   :  { %1066 = vmatpush3.msra.mxu1 %v1355_v56  ;;  %1023 = vmatpush3.msra.mxu0 %v1324_v36 }
  0xaa   :  { %1067 = vmatprep.subr.mxu1 %v1367_v62  ;;  %1024 = vmatprep.subr.mxu0 %v1349_v54 }
  0xab   :  { %1068 = vmatpush3.msra.mxu1 %v1367_v62  ;;  %1025 = vmatpush3.msra.mxu0 %v1349_v54 }
  0xac   :  { %1069 = vmatprep.subr.mxu1 %v1379_v4  ;;  %1026 = vmatprep.subr.mxu0 %v1352_v55 }
  0xad   :  { %1070 = vmatpush3.msra.mxu1 %v1379_v4  ;;  %1027 = vmatpush3.msra.mxu0 %v1352_v55 }
  0xae   :  { %1071 = vmatprep.subr.mxu1 %v1391_v16  ;;  %1028 = vmatprep.subr.mxu0 %v1364_v61 }
  0xaf   :  { %1072 = vmatpush3.msra.mxu1 %v1391_v16  ;;  %1029 = vmatpush3.msra.mxu0 %v1364_v61 }
  0xb0   :  { %1073 = vmatprep.subr.mxu1 %v1403_v37  ;;  %1030 = vmatprep.subr.mxu0 %v1376_v3 }
  0xb1   :  { %1074 = vmatpush3.msra.mxu1 %v1403_v37  ;;  %1031 = vmatpush3.msra.mxu0 %v1376_v3 }
  0xb2   :  { %1076 = vmatmul.mubr.f32.vlgmr.msra.gmra.mxu1 %v156_v5  ;;  %1113 = vmatprep.subr.mxu1 %v1253_v6 }
  0xb3   :  { %1032 = vmatprep.subr.mxu0 %v1388_v15  ;;  %1114 = vmatpush3.msra.mxu1 %v1253_v6 }
  0xb4   :  { %1145 = vmatprep.mubr.msk.f32.mxu1 %vm41_vm0, %v1214_v43  ;;  %1033 = vmatpush3.msra.mxu0 %v1388_v15 }
  0xb5   :  { %1115 = vmatprep.subr.mxu1 %v1255_v7  ;;  %1034 = vmatprep.subr.mxu0 %v1400_v34 }
  0xb6   :  { %1116 = vmatpush3.msra.mxu1 %v1255_v7  ;;  %1035 = vmatpush3.msra.mxu0 %v1400_v34 }
  0xb7   :  { %1117 = vmatprep.subr.mxu1 %v1257_v8  ;;  %1036 = vmatprep.subr.mxu0 %v1412_v41 }
  0xb8   :  { %1118 = vmatpush3.msra.mxu1 %v1257_v8  ;;  %1037 = vmatpush3.msra.mxu0 %v1412_v41 }
  0xb9   :  { %1119 = vmatprep.subr.mxu1 %v1259_v12  ;;  %1038 = vmatprep.subr.mxu0 %v1422_v46 }
  0xba   :  { %1120 = vmatpush3.msra.mxu1 %v1259_v12  ;;  %1039 = vmatpush3.msra.mxu0 %v1422_v46 }
  0xbb   :  { %1121 = vmatprep.subr.mxu1 %v1261_v13  ;;  %1041 = vmatmul.mubr.f32.vlgmr.msra.gmra.mxu0 %v1474_v63 }
  0xbc   :  { %1078 = vmatprep.subr.mxu0 %v1293_v26  ;;  %1122 = vmatpush3.msra.mxu1 %v1261_v13 }
  0xbd   :  { %1079 = vmatpush3.msra.mxu0 %v1293_v26  ;;  %1110 = vmatprep.mubr.msk.f32.mxu0 %vm41_vm0, %v1214_v43 }
  0xbe   :  { %1123 = vmatprep.subr.mxu1 %v1263_v14  ;;  %1080 = vmatprep.subr.mxu0 %v1296_v27 }
  0xbf   :  { %1124 = vmatpush3.msra.mxu1 %v1263_v14  ;;  %1081 = vmatpush3.msra.mxu0 %v1296_v27 }
  0xc0   :  { %1125 = vmatprep.subr.mxu1 %v1275_v20  ;;  %1082 = vmatprep.subr.mxu0 %v1299_v28 }
  0xc1   :  { %1126 = vmatpush3.msra.mxu1 %v1275_v20  ;;  %1083 = vmatpush3.msra.mxu0 %v1299_v28 }
  0xc2   :  { %1127 = vmatprep.subr.mxu1 %v1287_v24  ;;  %1084 = vmatprep.subr.mxu0 %v1303_v29 }
  0xc3   :  { %1128 = vmatpush3.msra.mxu1 %v1287_v24  ;;  %1085 = vmatpush3.msra.mxu0 %v1303_v29 }
  0xc4   :  { %1129 = vmatprep.subr.mxu1 %v1335_v47  ;;  %1086 = vmatprep.subr.mxu0 %v1306_v30 }
  0xc5   :  { %1130 = vmatpush3.msra.mxu1 %v1335_v47  ;;  %1087 = vmatpush3.msra.mxu0 %v1306_v30 }
  0xc6   :  { %1131 = vmatprep.subr.mxu1 %v1338_v48  ;;  %1088 = vmatprep.subr.mxu0 %v1320_v35 }
  0xc7   :  { %1132 = vmatpush3.msra.mxu1 %v1338_v48  ;;  %1089 = vmatpush3.msra.mxu0 %v1320_v35 }
  0xc8   :  { %1133 = vmatprep.subr.mxu1 %v1340_v49  ;;  %1090 = vmatprep.subr.mxu0 %v1332_v44 }
  0xc9   :  { %1134 = vmatpush3.msra.mxu1 %v1340_v49  ;;  %1091 = vmatpush3.msra.mxu0 %v1332_v44  ;;  %v770_v44 = vld [vmem:[%s1639_s1 + $0x8] sm:$0xff]  ;;  %s1215_s1 = smov [#allocation5]  }
  0xca   :  { %1135 = vmatprep.subr.mxu1 %v1355_v56  ;;  %1092 = vmatprep.subr.mxu0 %v1345_v51  ;;  %s806_s28 = sshll.u32 %s1215_s1, 4  ;;  %s807_s28 = int_to_ptr.vmem [resolvable:$true] %s806_s28 }
  0xcb   :  { %1136 = vmatpush3.msra.mxu1 %v1355_v56  ;;  %1093 = vmatpush3.msra.mxu0 %v1345_v51  ;;  %s1185_s29 = scalar_lea.vmem %s807_s28, 256  ;;  %p1190_p6 = scmp.lt.s32.totalorder %s807_s28, %s807_s28 }
  0xcc   :  { %1137 = vmatprep.subr.mxu1 %v1367_v62  ;;  %1094 = vmatprep.subr.mxu0 %v1361_v60  ;;  %p1186_p5 = scmp.ne.s32.totalorder %s807_s28, %s1185_s29  ;;  %p1191_p7 = scmp.lt.s32.totalorder %s1185_s29, %s1185_s29 }
  0xcd   :  { %1138 = vmatpush3.msra.mxu1 %v1367_v62  ;;  %1095 = vmatpush3.msra.mxu0 %v1361_v60  ;;  %v773_v60 = vpop.permute.xlu0 %772 }
  0xce   :  { %1139 = vmatprep.subr.mxu1 %v1379_v4  ;;  %1096 = vmatprep.subr.mxu0 %v1373_v2  ;;  %vm777_vm2 = vcmp.eq.s32.totalorder %v1450_v32, %v773_v60  ;;  %p1192_p8 = por %p1191_p7, %p1190_p6 }
  0xcf   :  { %1140 = vmatpush3.msra.mxu1 %v1379_v4  ;;  %1097 = vmatpush3.msra.mxu0 %v1373_v2 }
  0xd0   :  { %1141 = vmatprep.subr.mxu1 %v1391_v16  ;;  %1098 = vmatprep.subr.mxu0 %v1385_v11  ;;  %p1193_p9 = pnand %p1192_p8, %p1186_p5 }
  0xd1   :  { %1142 = vmatpush3.msra.mxu1 %v1391_v16  ;;  %1099 = vmatpush3.msra.mxu0 %v1385_v11 }
  0xd2   :  { %1143 = vmatprep.subr.mxu1 %v1403_v37  ;;  %1100 = vmatprep.subr.mxu0 %v1397_v33 }
  0xd3   :  { %1144 = vmatpush3.msra.mxu1 %v1403_v37  ;;  %1101 = vmatpush3.msra.mxu0 %v1397_v33 }
  0xd4   :  { %1146 = vmatmul.mubr.msk.f32.vlgmr.msra.gmra.mxu1 %vm42_vm1, %v1214_v43  ;;  %1102 = vmatprep.subr.mxu0 %v1409_v40 }
  0xd5   :  { %1103 = vmatpush3.msra.mxu0 %v1409_v40 }
  0xd6   :  { %1104 = vmatprep.subr.mxu0 %v1419_v45 }
  0xd7   :  { %1105 = vmatpush3.msra.mxu0 %v1419_v45 }
  0xd8   :  { %1106 = vmatprep.subr.mxu0 %v1429_v53 }
  0xd9   :  { %1107 = vmatpush3.msra.mxu0 %v1429_v53 }
  0xda   :  { %1108 = vmatprep.subr.mxu0 %v1436_v59 }
  0xdb   :  { %1109 = vmatpush3.msra.mxu0 %v1436_v59 }
  0xdc   :  { %1111 = vmatmul.mubr.msk.f32.vlgmr.msra.gmra.mxu0 %vm42_vm1, %v1214_v43 }
 0x151   :  { %v1007_v7 = vpop.f32.mrf.mxu1 }
 0x153   :  { %v311_v13 = vpop.f32.mrf.mxu1 }
 0x15a   :  { %v972_v6 = vpop.f32.mrf.mxu0 }
 0x15b   :  { %v318_v14 = vadd.f32 %v1007_v7, %v972_v6 }
 0x15c   :  { %v150_v8 = vpop.f32.mrf.mxu0 }
 0x15d   :  { %v312_v19 = vadd.f32 %v311_v13, %v150_v8 }
 0x172   :  { %v1077_v17 = vpop.f32.mrf.mxu1 }
 0x174   :  { %v517_v22 = vpop.f32.mrf.mxu1 }
 0x17b   :  { %v1042_v12 = vpop.f32.mrf.mxu0 }
 0x17c   :  { %v429_v20 = vadd.f32 %v1042_v12, %v318_v14 }
 0x17d   :  { %v421_v18 = vpop.f32.mrf.mxu0 }
 0x17e   :  { %v422_v21 = vadd.f32 %v421_v18, %v312_v19  ;;  %v526_v23 = vadd.f32 %v1077_v17, %v429_v20 }
 0x180   :  { %v518_v28 = vadd.f32 %v517_v22, %v422_v21 }
 0x194   :  { %v1147_v24 = vpop.f32.mrf.mxu1 }
 0x196   :  { %v737_v35 = vpop.f32.mrf.mxu1 }
 0x19c   :  { %v1112_v26 = vpop.f32.mrf.mxu0 }
 0x19d   :  { %v651_v27 = vadd.f32 %v1112_v26, %v526_v23 }
 0x19e   :  { %v644_v29 = vpop.f32.mrf.mxu0 }
 0x19f   :  { %v744_v30 = vadd.f32 %v1147_v24, %v651_v27  ;;  %v645_v31 = vadd.f32 %v644_v29, %v518_v28 }
 0x1a1   :  { %748 = vst [vmem:[#allocation5 + $0x8] sm:$0xff] %v744_v30  ;;  %v738_v36 = vadd.f32 %v737_v35, %v645_v31 }
 0x1a3   :  { %747 = vst [vmem:[#allocation5] sm:$0xff] %v738_v36  ;;  %749 = vmax.xlane.f32.xlu1 %v738_v36  ;;  %v779_v2 = vsel %vm777_vm2, %v738_v36, 0.0 }
 0x1a7   :  { %751 = vmax.xlane.f32.xlu1 %v744_v30 }
 0x1b8   :  { %775 = vperm.xlu1 %1156, %v770_v44  }
 0x22c   :  { %v750_v47 = vpop.xlane.xlu1 %749 }
 0x22d   :  { %v753_v48 = vsub.f32 %v738_v36, %v750_v47 }
 0x22f   :  { %v755_v49 = vmul.f32 1.442695, %v753_v48 }
 0x230   :  { %v752_v51 = vpop.xlane.xlu1 %751 }
 0x231   :  { %1157 = vpow2.f32 %v755_v49  ;;  %v754_v54 = vsub.f32 %v744_v30, %v752_v51 }
 0x233   :  { %v757_v55 = vmul.f32 1.442695, %v754_v54 }
 0x234   :  { %v776_v61 = vpop.permute.xlu1 %775 }
 0x235   :  { %1159 = vpow2.f32 %v757_v55  ;;  %vm778_vm3 = vcmp.eq.s32.totalorder %v1450_v32, %v776_v61 }
 0x236   :  { %v780_v3 = vsel %vm778_vm3, %v744_v30, 0.0 }
 0x23e   :  { %v1158_v56 = vpop.eup %1157 }
 0x23f   :  { %759 = vadd.xlane.f32.xlu0 %v1158_v56 }
 0x242   :  { %v1160_v62 = vpop.eup %1159 }
 0x243   :  { %761 = vadd.xlane.f32.xlu1 %v1160_v62  ;;  %781 = vadd.xlane.f32.xlu0 %v779_v2 }
 0x247   :  { %783 = vadd.xlane.f32.xlu0 %v780_v3 }
 0x248   :  { %1196 = shalt.err (!%p1193_p9)
}
 0x249   :  { %812 = dma.vmem_to_hbm [thread:$0]  %s807_s28, 256, %s1641_s3, [#allocation4], %s1210_s18, %s1210_s18, %s1211_s19   ;;  %vm798_vm4 = vcmask 7168  }
 0x2c8   :  { %v760_v4 = vpop.xlane.xlu0 %759 }
 0x2c9   :  { %1161 = vlog2.f32 %v760_v4 }
 0x2cc   :  { %v762_v11 = vpop.xlane.xlu1 %761  ;;  %v782_v33 = vpop.xlane.xlu0 %781 }
 0x2cd   :  { %1163 = vlog2.f32 %v762_v11 }
 0x2d0   :  { %v784_v46 = vpop.xlane.xlu0 %783 }
 0x2d6   :  { %v1162_v15 = vpop.eup %1161 }
 0x2d7   :  { %v764_v16 = vmul.f32 0.6931472, %v1162_v15 }
 0x2d9   :  { %v767_v34 = vadd.f32 %v764_v16, %v750_v47 }
 0x2da   :  { %v1164_v37 = vpop.eup %1163 }
 0x2db   :  { %v766_v40 = vmul.f32 0.6931472, %v1164_v37  ;;  %v794_v41 = vsub.f32 %v767_v34, %v782_v33 }
 0x2dd   :  { %799 = vst.msk [vmem:[%s1642_s4] sm:$0xff] %vm798_vm4, %v794_v41  ;;  %v768_v45 = vadd.f32 %v766_v40, %v752_v51 }
 0x2df   :  { %v795_v53 = vsub.f32 %v768_v45, %v784_v46 }
 0x2e1   :  { %800 = vst.msk [vmem:[%s1642_s4 + $0x8] sm:$0xff] %vm798_vm4, %v795_v53 }
 0x2e2   :  { %1207 = dma.done.wait [#allocation4], 256  }
 0x2e3   :  { %1208 = vsyncadd [#allocation4], 4294967040 }
 0x2e4   :  { %820 = vsyncpa [#allocation3], 1 }
 0x2e5   :  { %821 = vsyncpa [#allocation4], 1 }

</bundles_post_ra>
